<compile_context>
chip_gen: v7x
topology: tpu7x:2x2x1
jax: 0.10.0
libtpu: 0.0.40
codegen_flags: <defaults>
</compile_context>

<pallas_src>
import functools

import jax
import jax.numpy as jnp
from jax.experimental import pallas as pl
from jax.experimental.pallas import tpu as pltpu


def _ceil(a, m):
    return -(-a // m) * m


def _conv_kernel(x_ref, w_ref, b_ref, o_ref, *, kh_size, kw_size, stride,
                 th, w_out, c_in, k_dim, use_relu):
    # x_ref : (Cin, Hp, Wp)     padded input, one batch element, mxu dtype
    # w_ref : (Cout, K)         K = KH*KW*Cin, row order (kh, kw, cin), mxu dtype
    # b_ref : (Cout, 1)         f32
    # o_ref : (Cout, TH*Wout)   one row tile, spatial flattened on lanes
    r = pl.program_id(1)
    h_start = r * (th * stride)
    if (th * stride) % 8 == 0:
        h_start = pl.multiple_of(h_start, 8)      # aligned sublane offset

    th_in = (th - 1) * stride + kh_size           # padded rows needed per tile
    xs = x_ref[:, pl.ds(h_start, th_in), :]       # (Cin, th_in, Wp)

    if stride == 1:
        # Flatten each of the KW width-slabs ONCE; every (kh, kw) tap is then a
        # contiguous lane slice of the flattened slab, so no (K,TH,Wout) ->
        # (K,TH*Wout) cross-lane relayout is needed.
        slabs = []
        for kw in range(kw_size):
            slab = xs[:, :, kw:kw + w_out]                       # (Cin, th_in, Wout)
            slabs.append(slab.reshape(c_in, th_in * w_out))       # flatten once
        taps = []
        for kh in range(kh_size):
            for kw in range(kw_size):
                taps.append(slabs[kw][:, kh * w_out: kh * w_out + th * w_out])
        patches = jnp.concatenate(taps, axis=0)                   # (K, TH*Wout)
    else:
        # TODO(synk): stride > 1 fallback is correct but not tuned (strided
        # VMEM slicing + one relayout reshape); validate lowering before
        # relying on it for performance.
        hs_span = (th - 1) * stride + 1
        ws_span = (w_out - 1) * stride + 1
        taps = []
        for kh in range(kh_size):
            for kw in range(kw_size):
                taps.append(xs[:, kh:kh + hs_span:stride,
                               kw:kw + ws_span:stride])
        patches = jnp.concatenate(taps, axis=0).reshape(k_dim, th * w_out)

    # Single fused matmul per tile: (Cout, K) @ (K, TH*Wout), f32 accumulation.
    acc = jnp.dot(w_ref[...], patches, preferred_element_type=jnp.float32)
    acc = acc + b_ref[...]
    if use_relu:
        acc = jnp.maximum(acc, 0.0)
    o_ref[...] = acc.astype(o_ref.dtype)


def _vmem_capacity_bytes():
    try:
        cap = getattr(pltpu.get_tpu_info(), "vmem_capacity_bytes", None)
        if cap:
            return int(cap)
    except Exception:
        pass
    return 64 << 20     # conservative (v7x per-core) fallback


def _pick_row_tile(h_out, w_out, fits):
    """Largest divisor of Hout fitting VMEM; prefer lane-dense (256x), <=2048 lanes."""
    cands = [t for t in range(1, h_out + 1) if h_out % t == 0 and fits(t)]
    if not cands:
        return 1

    def score(t):
        lanes = t * w_out
        dense = 2 if lanes % 256 == 0 else (1 if lanes % 128 == 0 else 0)
        in_range = lanes <= 2048
        return (dense, in_range, t if in_range else -t)

    return max(cands, key=score)


def convlayer_forward(x_nchw, weight, bias, *, stride, padding,
                      use_norm=False, use_relu=True,
                      mxu_dtype=jnp.bfloat16, out_dtype=None):
    """Pallas equivalent of Convlayer.forward.

    x_nchw : (N, Cin, H, W) float32
    weight : (Cout, Cin, KH, KW) float32   (PyTorch conv weight layout)
    bias   : (Cout,) float32
    mxu_dtype : MXU operand dtype (bf16 = full-rate MXU on v6e/v7x, f32
                accumulation always used; pass jnp.float32 for bit-faithful
                results vs. the f32 PyTorch reference).
    out_dtype : output dtype (default = input dtype; pass jnp.bfloat16 if the
                downstream consumer accepts it to halve writeback bytes).
    """
    n, c_in, h, w = x_nchw.shape
    c_out, c_in_w, kh_size, kw_size = weight.shape
    assert c_in_w == c_in

    # TODO(synk): use_norm branch references self.bn which is never defined in
    # the PyTorch module's __init__, so it is only valid for use_norm=False.
    assert not use_norm

    out_dtype = x_nchw.dtype if out_dtype is None else out_dtype
    h_out = (h + 2 * padding - kh_size) // stride + 1
    w_out = (w + 2 * padding - kw_size) // stride + 1
    hp, wp = h + 2 * padding, w + 2 * padding
    hw_out = h_out * w_out
    k_dim = kh_size * kw_size * c_in
    mxu_isz = jnp.dtype(mxu_dtype).itemsize
    out_isz = jnp.dtype(out_dtype).itemsize

    # Cast to the MXU operand dtype in the wrapper (halves input DMA bytes and
    # VMEM residency), then spatial zero-pad.  No layout transpose.
    x_pad = jnp.pad(x_nchw.astype(mxu_dtype),
                    ((0, 0), (0, 0), (padding, padding), (padding, padding)))

    # (Cout, Cin, KH, KW) -> (Cout, KH, KW, Cin) -> (Cout, K); tiny, one-time.
    w2 = jnp.transpose(weight, (0, 2, 3, 1)).reshape(c_out, k_dim).astype(mxu_dtype)
    b2 = bias.reshape(c_out, 1).astype(jnp.float32)

    # --- VMEM-budget-driven row-tile selection ------------------------------
    vmem_cap = _vmem_capacity_bytes()

    def est_vmem_bytes(th):
        lanes = _ceil(th * w_out, 128)
        th_in = (th - 1) * stride + kh_size
        wp_l = max(_ceil(wp, 128), 128)              # lane padding when Wp < 128
        inp = 2 * c_in * _ceil(hp, 8) * wp_l * mxu_isz          # dbl-buffered image
        wgt = 2 * _ceil(c_out, 8) * _ceil(k_dim, 128) * mxu_isz
        bia = 2 * _ceil(c_out, 8) * 128 * 4
        outb = 2 * _ceil(c_out, 8) * lanes * out_isz
        slabs = kw_size * _ceil(c_in, 8) * _ceil(th_in * w_out, 128) * mxu_isz
        patch = 2 * _ceil(k_dim, 8) * lanes * mxu_isz           # slab + copy headroom
        accb = _ceil(c_out, 8) * lanes * 4
        return inp + wgt + bia + outb + slabs + patch + accb

    budget = vmem_cap // 2
    th = _pick_row_tile(h_out, w_out, lambda t: est_vmem_bytes(t) <= budget)
    n_rb = h_out // th

    est_bytes = est_vmem_bytes(th)
    vmem_limit = int(min(vmem_cap * 3 // 4, max(2 * est_bytes, 16 << 20)))
    vmem_limit = int(min(max(vmem_limit, est_bytes + (2 << 20)),
                         vmem_cap - (2 << 20)))

    # Batch-only megacore sharding when N >= 2 so the same padded image is
    # never DMA'd into both v7x TensorCores; single-image case keeps both axes
    # parallel so there is still work to shard.
    dim_sem = ("parallel", "arbitrary") if n >= 2 else ("parallel", "parallel")

    kernel = functools.partial(
        _conv_kernel, kh_size=kh_size, kw_size=kw_size, stride=stride,
        th=th, w_out=w_out, c_in=c_in, k_dim=k_dim, use_relu=use_relu)

    cost = pl.CostEstimate(
        flops=int(2 * n * hw_out * k_dim * c_out),
        transcendentals=0,
        bytes_accessed=int(x_pad.size * mxu_isz + w2.size * mxu_isz
                           + b2.size * 4 + n * c_out * hw_out * out_isz))

    out_flat = pl.pallas_call(
        kernel,
        out_shape=jax.ShapeDtypeStruct((n, c_out, hw_out), out_dtype),
        grid_spec=pltpu.PrefetchScalarGridSpec(
            num_scalar_prefetch=0,
            grid=(n, n_rb),
            in_specs=[
                # Whole padded image per batch element; constant over the
                # row-block axis so it is DMA'd once per batch element.
                pl.BlockSpec((None, c_in, hp, wp), lambda b, r: (b, 0, 0, 0)),
                pl.BlockSpec((c_out, k_dim), lambda b, r: (0, 0)),
                pl.BlockSpec((c_out, 1), lambda b, r: (0, 0)),
            ],
            out_specs=pl.BlockSpec((None, c_out, th * w_out),
                                   lambda b, r: (b, 0, r)),
        ),
        compiler_params=pltpu.CompilerParams(
            dimension_semantics=dim_sem,
            vmem_limit_bytes=vmem_limit),
        cost_estimate=cost,
    )(x_pad, w2, b2)

    # (N, Cout, Hout*Wout) -> (N, Cout, Hout, Wout): contiguous minor-dim
    # reshape, metadata-only.
    return out_flat.reshape(n, c_out, h_out, w_out)


def _reference(x_nchw, weight, bias, *, stride, padding, use_relu):
    out = jax.lax.conv_general_dilated(
        x_nchw, weight,
        window_strides=(stride, stride),
        padding=((padding, padding), (padding, padding)),
        dimension_numbers=("NCHW", "OIHW", "NCHW"))
    out = out + bias.reshape(1, -1, 1, 1)
    if use_relu:
        out = jnp.maximum(out, 0.0)
    return out


if __name__ == "__main__":
    # Convlayer(in_channels=4, out_channels=8, kernel_size=3, stride=1,
    #           padding=1, use_norm=False, use_relu=True)
    N, C_IN, C_OUT, H, W = 2, 4, 8, 16, 16
    KH = KW = 3
    STRIDE, PADDING = 1, 1

    key = jax.random.PRNGKey(0)
    kx, kw_, kb = jax.random.split(key, 3)
    x = jax.random.normal(kx, (N, C_IN, H, W), dtype=jnp.float32)
    weight = jax.random.normal(kw_, (C_OUT, C_IN, KH, KW), dtype=jnp.float32) * 0.1
    bias = jax.random.normal(kb, (C_OUT,), dtype=jnp.float32) * 0.1

    ref = _reference(x, weight, bias, stride=STRIDE, padding=PADDING,
                     use_relu=True)

    # Exact f32-operand path: matches the PyTorch/lax reference tightly.
    out_f32 = convlayer_forward(x, weight, bias, stride=STRIDE, padding=PADDING,
                                use_norm=False, use_relu=True,
                                mxu_dtype=jnp.float32)
    out_f32 = jax.block_until_ready(out_f32)
    assert out_f32.shape == (N, C_OUT, H, W)
    assert jnp.allclose(out_f32, ref, rtol=1e-3, atol=1e-3)

    # Default bf16-operand path (full-rate MXU on v6e/v7x), f32 accumulation.
    out_bf16 = convlayer_forward(x, weight, bias, stride=STRIDE, padding=PADDING,
                                 use_norm=False, use_relu=True)
    out_bf16 = jax.block_until_ready(out_bf16)
    assert out_bf16.shape == (N, C_OUT, H, W)
    assert jnp.allclose(out_bf16, ref, rtol=5e-2, atol=5e-2)

    print("KERNEL_OK")
</pallas_src>

<mosaic_0001>
module attributes {stable_mosaic.version = 11 : i64} {
  func.func @_conv_kernel(%arg0: i32, %arg1: i32, %arg2: memref<1x4x18x18xf32, #tpu.memory_space<vmem>>, %arg3: memref<8x36xf32, #tpu.memory_space<vmem>>, %arg4: memref<8x1xf32, #tpu.memory_space<vmem>>, %arg5: memref<1x8x256xf32, #tpu.memory_space<vmem>>) attributes {dimension_semantics = [#tpu.dimension_semantics<parallel>, #tpu.dimension_semantics<arbitrary>], iteration_bounds = array<i64: 2, 1>, scalar_prefetch = 0 : i64, scratch_operands = 0 : i64, tpu.core_type = #tpu.core_type<tc>, window_params = [{transform_indices = @transform_0, window_bounds = array<i64: 1, 4, 18, 18>}, {pipeline_mode = #tpu.pipeline_mode<synchronous>, transform_indices = @transform_1, window_bounds = array<i64: 8, 36>}, {pipeline_mode = #tpu.pipeline_mode<synchronous>, transform_indices = @transform_2, window_bounds = array<i64: 8, 1>}, {transform_indices = @transform_3, window_bounds = array<i64: 1, 8, 256>}]} {
    %c16_i32 = arith.constant 16 : i32
    %0 = arith.muli %arg1, %c16_i32 : i32
    %1 = tpu.assume_multiple %0, 8 : i32
    %c0 = arith.constant 0 : index
    %c0_0 = arith.constant 0 : index
    %2 = arith.index_cast %1 : i32 to index
    %c0_1 = arith.constant 0 : index
    %3 = vector.load %arg2[%c0, %c0_0, %2, %c0_1] : memref<1x4x18x18xf32, #tpu.memory_space<vmem>>, vector<1x4x18x18xf32>
    %4 = vector.shape_cast %3 : vector<1x4x18x18xf32> to vector<4x18x18xf32>
    %5 = vector.extract_strided_slice %4 {offsets = [0, 0, 0], sizes = [4, 18, 16], strides = [1, 1, 1]} : vector<4x18x18xf32> to vector<4x18x16xf32>
    %6 = vector.shape_cast %5 : vector<4x18x16xf32> to vector<4x288xf32>
    %7 = vector.extract_strided_slice %4 {offsets = [0, 0, 1], sizes = [4, 18, 16], strides = [1, 1, 1]} : vector<4x18x18xf32> to vector<4x18x16xf32>
    %8 = vector.shape_cast %7 : vector<4x18x16xf32> to vector<4x288xf32>
    %9 = vector.extract_strided_slice %4 {offsets = [0, 0, 2], sizes = [4, 18, 16], strides = [1, 1, 1]} : vector<4x18x18xf32> to vector<4x18x16xf32>
    %10 = vector.shape_cast %9 : vector<4x18x16xf32> to vector<4x288xf32>
    %11 = vector.extract_strided_slice %6 {offsets = [0, 0], sizes = [4, 256], strides = [1, 1]} : vector<4x288xf32> to vector<4x256xf32>
    %12 = vector.extract_strided_slice %8 {offsets = [0, 0], sizes = [4, 256], strides = [1, 1]} : vector<4x288xf32> to vector<4x256xf32>
    %13 = vector.extract_strided_slice %10 {offsets = [0, 0], sizes = [4, 256], strides = [1, 1]} : vector<4x288xf32> to vector<4x256xf32>
    %14 = vector.extract_strided_slice %6 {offsets = [0, 16], sizes = [4, 256], strides = [1, 1]} : vector<4x288xf32> to vector<4x256xf32>
    %15 = vector.extract_strided_slice %8 {offsets = [0, 16], sizes = [4, 256], strides = [1, 1]} : vector<4x288xf32> to vector<4x256xf32>
    %16 = vector.extract_strided_slice %10 {offsets = [0, 16], sizes = [4, 256], strides = [1, 1]} : vector<4x288xf32> to vector<4x256xf32>
    %17 = vector.extract_strided_slice %6 {offsets = [0, 32], sizes = [4, 256], strides = [1, 1]} : vector<4x288xf32> to vector<4x256xf32>
    %18 = vector.extract_strided_slice %8 {offsets = [0, 32], sizes = [4, 256], strides = [1, 1]} : vector<4x288xf32> to vector<4x256xf32>
    %19 = vector.extract_strided_slice %10 {offsets = [0, 32], sizes = [4, 256], strides = [1, 1]} : vector<4x288xf32> to vector<4x256xf32>
    %20 = tpu.concatenate %11, %12, %13, %14, %15, %16, %17, %18, %19 in 0 : vector<4x256xf32>, vector<4x256xf32>, vector<4x256xf32>, vector<4x256xf32>, vector<4x256xf32>, vector<4x256xf32>, vector<4x256xf32>, vector<4x256xf32>, vector<4x256xf32> -> vector<36x256xf32>
    %c0_2 = arith.constant 0 : index
    %c0_3 = arith.constant 0 : index
    %21 = vector.load %arg3[%c0_2, %c0_3] : memref<8x36xf32, #tpu.memory_space<vmem>>, vector<8x36xf32>
    %cst = arith.constant dense<0.000000e+00> : vector<8x256xf32>
    %22 = tpu.matmul %21, %20, %cst {dimension_numbers = #tpu.dot_dimension_numbers<[1], [0], [0], [1], [0, 0, 1, 1], [], []>} : vector<8x36xf32>, vector<36x256xf32>, vector<8x256xf32> -> vector<8x256xf32>
    %c0_4 = arith.constant 0 : index
    %c0_5 = arith.constant 0 : index
    %23 = vector.load %arg4[%c0_4, %c0_5] : memref<8x1xf32, #tpu.memory_space<vmem>>, vector<8x1xf32>
    %24 = vector.broadcast %23 : vector<8x1xf32> to vector<8x256xf32>
    %25 = arith.addf %22, %24 : vector<8x256xf32>
    %cst_6 = arith.constant 0.000000e+00 : f32
    %26 = vector.broadcast %cst_6 : f32 to vector<8x256xf32>
    %27 = arith.maximumf %25, %26 : vector<8x256xf32>
    %c0_7 = arith.constant 0 : index
    %c0_8 = arith.constant 0 : index
    %c0_9 = arith.constant 0 : index
    %28 = vector.load %arg5[%c0_7, %c0_8, %c0_9] : memref<1x8x256xf32, #tpu.memory_space<vmem>>, vector<1x8x256xf32>
    %29 = vector.shape_cast %28 : vector<1x8x256xf32> to vector<8x256xf32>
    %30 = vector.shape_cast %27 : vector<8x256xf32> to vector<1x8x256xf32>
    tpu.vector_store %arg5[%c0_7, %c0_8, %c0_9], %30 {strides = array<i32>} : memref<1x8x256xf32, #tpu.memory_space<vmem>>, vector<1x8x256xf32>,
    return
  }
  func.func @transform_0(%arg0: i32, %arg1: i32) -> (i32, i32, i32, i32) {
    %c0_i32 = arith.constant 0 : i32
    %c0_i32_0 = arith.constant 0 : i32
    %c0_i32_1 = arith.constant 0 : i32
    %c0_i32_2 = arith.constant 0 : i32
    return %arg0, %c0_i32, %c0_i32_0, %c0_i32_1 : i32, i32, i32, i32
  }
  func.func @transform_1(%arg0: i32, %arg1: i32) -> (i32, i32) {
    %c0_i32 = arith.constant 0 : i32
    %c0_i32_0 = arith.constant 0 : i32
    %c0_i32_1 = arith.constant 0 : i32
    return %c0_i32, %c0_i32_0 : i32, i32
  }
  func.func @transform_2(%arg0: i32, %arg1: i32) -> (i32, i32) {
    %c0_i32 = arith.constant 0 : i32
    %c0_i32_0 = arith.constant 0 : i32
    %c0_i32_1 = arith.constant 0 : i32
    return %c0_i32, %c0_i32_0 : i32, i32
  }
  func.func @transform_3(%arg0: i32, %arg1: i32) -> (i32, i32, i32) {
    %c0_i32 = arith.constant 0 : i32
    %c0_i32_0 = arith.constant 0 : i32
    return %arg0, %c0_i32, %arg1 : i32, i32, i32
  }
}

</mosaic_0001>

<bundles_post_ra>
// kernel: tpu_custom_call.1
= control target key start
LH: loop header
LB: loop body
LE: loop exit
PB: predicated region body
PF: predicated region fallthrough
CT: control target
= control target key end

     0   :  { %8 = vsyncpa [#allocation3], 0  ;;  %s2069_s0 = inlined_call_operand.vmem [shape: f32[2,4,18,18], index: 0, kind: input, shape index: {}]   ;;  %s2070_s1 = inlined_call_operand.vmem [shape: f32[8,36], index: 1, kind: input, shape index: {}]   ;;  %s2071_s2 = inlined_call_operand.vmem [shape: f32[8,1], index: 2, kind: input, shape index: {}]   ;;  %s2072_s3 = inlined_call_operand.hbm [shape: f32[2,8,256], index: 3, kind: output, shape index: {}]  }
   0x1   :  { %10 = vsyncpa [#allocation3 + $0x1], 0  ;;  %s1592_s12 = smov 0   ;;  %s1594_s13 = smov 0  }
   0x2   :  { %s1596_s14 = smov 0   ;;  %s1598_s15 = smov 0  }
   0x3   :  { %s1600_s16 = smov 0   ;;  %s1602_s17 = smov 0  }
   0x4 LB: > { %s1263_s18 = sadd.s32 4294967295, %s1556_s17   ;;  %s1264_s19 = sadd.s32 4294967294, %s1556_s17   ;;  %s1556_s17 = sphi %s1602_s17, %s16_s17   ;;  %s1552_s16 = sphi %s1600_s16, %s2079_s16   ;;  %s1548_s15 = sphi %s1598_s15, %s2078_s15   ;;  %s1544_s14 = sphi %s1596_s14, %s2077_s14   ;;  %s1540_s13 = sphi %s1594_s13, %s2076_s13   ;;  %s1536_s12 = sphi %s1592_s12, %s2075_s12  }
   0x5   : > { %s28_s20 = sadd.s32 1, %s1552_s16  ;;  %s105_s21 = sadd.s32 1, %s1544_s14 }
   0x6   : > { %p30_p0 = scmp.ge.s32.totalorder %s28_s20, 2  ;;  %p115_p1 = scmp.ne.s32.totalorder %s1544_s14, %s1540_s13 }
   0x7   : > { %p116_p2 = scmp.eq.s32.totalorder %s1263_s18, 1  ;;  %p121_p3 = scmp.ne.s32.totalorder %s1540_s13, %s1536_s12 }
   0x8   : > { %s2081_s20 = smov (%p30_p0, %s28_s20), 0  ;;  %p122_p5 = scmp.eq.s32.totalorder %s1264_s19, 1 }
   0x9   : > { %p1632_p4 = por %p116_p2, %p115_p1  ;;  %s100_s23 = ssub.s32 %s1552_s16, %s2081_s20 }
   0xa   : > { %p1267_p6 = scmp.ge.s32.totalorder %s1556_s17, 1  ;;  %p103_p7 = scmp.eq.s32.totalorder %s100_s23, 0 }
   0xb   : > { %p1639_p8 = por %p122_p5, %p121_p3  ;;  %p154_p9 = scmp.lt.s32.totalorder %s1556_s17, 3 }
   0xc   : > { %s1645_s25 = scalar_select %p103_p7, %s1544_s14, %s105_s21  }
   0xd   : > { %p155_p10 = pnand %p1267_p6, %p154_p9 }
   0xe   : > { %p178_p11 = scmp.lt.s32.totalorder (!%p155_p10), %s1548_s15, 1  ;;  %v1558_v0 = vmov (!%p155_p10), 1983009808   ;;  %v203_v2 = vlaneseq (!%p155_p10)  ;;  %v1559_v3 = vmov (!%p155_p10), 0.0   ;;  %s1560_s4 = smov (!%p155_p10), 127   ;;  %vm419_vm0 = vcmask (!%p155_p10), 130048  }
   0xf   : > { %158 = sbr.rel (%p155_p10) target bundleno = 702 (0x2be), region = 32  ;;  %v201_v1 = vunpack.c.l.s4 (!%p155_p10), %v1558_v0  ;;  %1163 = vmatprep.mubr.f32.mxu0 (!%p155_p10), %v1559_v3  ;;  %s1561_s5 = smov (!%p155_p10), 126   ;;  %v1562_v28 = vmov (!%p155_p10), 1934713408   ;;  %vm421_vm1 = vcmask (!%p155_p10), 261120   ;;  %vm423_vm2 = vcmask (!%p155_p10), 392192  }
  0x10   : > { %v204_v7 = vshrl.u32 (!%p155_p10), %v203_v2, 7  ;;  %v233_v29 = vunpack.c.l.s4 (!%p155_p10), %v1562_v28  ;;  %s1563_s6 = smov (!%p155_p10), 32   ;;  %s1564_s7 = smov (!%p155_p10), 16   ;;  %vm425_vm3 = vcmask (!%p155_p10), 523264   ;;  %vm427_vm4 = vcmask (!%p155_p10), 654336  }
  0x11   : > { %v202_v6 = vunpack.c.0.s8 (!%p155_p10), %v201_v1  ;;  %s1565_s8 = smov (!%p155_p10), 64   ;;  %s1566_s9 = smov (!%p155_p10), 48   ;;  %vm429_vm5 = vcmask (!%p155_p10), 785408   ;;  %vm431_vm6 = vcmask (!%p155_p10), 916480   ;;  %vm1075_vm7 = vcmask (!%p155_p10), 1043456  }
  0x12   : > { %v234_v34 = vunpack.c.0.s8 (!%p155_p10), %v233_v29  ;;  %s1567_s10 = smov (!%p155_p10), 96   ;;  %s1568_s11 = smov (!%p155_p10), 80   ;;  %vm1091_vm8 = vcmask (!%p155_p10), 293888  }
  0x13   : > { %v1665_v12 = vsub.s32 (!%p155_p10), %v202_v6, %v204_v7  ;;  %s1569_s18 = smov (!%p155_p10), 112   ;;  %s1278_s29 = sshll.u32 (!%p155_p10), %s1548_s15, 8 }
  0x14   : > { %v1705_v39 = vsub.s32 (!%p155_p10), %v234_v34, %v204_v7 }
  0x16   : > { %s179_s26 = scalar_select %p178_p11, %s1548_s15, 1 }
  0x17   : > { %s1571_s15 = smov [#allocation2]  }
  0x18   : > { %s1287_s27 = smul.u32 96, %s179_s26 }
  0x1a   : > { %s1653_s30 = scalar_lea.vmem %s2069_s0, %s1287_s27  ;;  %s175_s27 = sand.u32 1, %s1540_s13  }
  0x1b   : > { %v193_v4 = vld [vmem:[%s1653_s30 + $0x38] sm:$0xff]  ;;  %v187_v5 = vld [vmem:[%s1653_s30 + $0x8] sm:$0xff]  ;;  %v196_v8 = vld [vmem:[%s1653_s30 + $0x50] sm:$0xff]  ;;  %s1268_s28 = sshll.u32 %s175_s27, 4 }
  0x1c   : > { %467 = vrot.lane.b32.xlu1 %v193_v4, %s1560_s4  ;;  %455 = vrot.lane.b32.xlu0 %v187_v5, %s1560_s4  ;;  %v190_v9 = vld [vmem:[%s1653_s30 + $0x20] sm:$0xff]  ;;  %v191_v10 = vld [vmem:[%s1653_s30 + $0x28] sm:$0x3]  ;;  %v266_v24 = vcombine.low %v187_v5, %v193_v4  ;;  %v267_v35 = vcombine.high %v187_v5, %v193_v4 }
  0x1d   : > { %v1663_v11 = vld [vmem:[%s1653_s30 + $0x58] sm:$0x3]  ;;  %v188_v13 = vld [vmem:[%s1653_s30 + $0x10] sm:$0x3]  ;;  %v1672_v15 = vld [vmem:[%s1653_s30 + $0x40] sm:$0x3]  ;;  %v282_v25 = vcombine.low %v190_v9, %v196_v8  ;;  %v283_v36 = vcombine.high %v190_v9, %v196_v8 }
  0x1e   : > { %v342_v14 = vcombine.low %v191_v10, %v1663_v11  ;;  %v334_v16 = vcombine.low %v188_v13, %v1672_v15  ;;  %v189_v20 = vld [vmem:[%s1653_s30 + $0x18] sm:$0xff]  ;;  %v186_v21 = vld [vmem:[%s1653_s30] sm:$0xff]  ;;  %v195_v22 = vld [vmem:[%s1653_s30 + $0x48] sm:$0xff]  ;;  %v274_v30 = vrot.slane %v266_v24, %v1665_v12  ;;  %v281_v42 = vrot.slane %v267_v35, %v1665_v12 }
  0x1f   : > { %v192_v23 = vld [vmem:[%s1653_s30 + $0x30] sm:$0xff]  ;;  %v214_v26 = vcombine.low %v189_v20, %v195_v22  ;;  %v290_v31 = vrot.slane %v282_v25, %v1665_v12  ;;  %v215_v37 = vcombine.high %v189_v20, %v195_v22  ;;  %v297_v43 = vrot.slane %v283_v36, %v1665_v12  ;;  %s177_s30 = scalar_lea.vmem [#allocation2], %s1268_s28 }
  0x20   : > { %473 = vrot.lane.b32.xlu1 %v196_v8, %s1560_s4  ;;  %461 = vrot.lane.b32.xlu0 %v190_v9, %s1560_s4  ;;  %v1676_v17 = vrot.slane %v342_v14, %v1665_v12  ;;  %v1679_v18 = vrot.slane %v334_v16, %v1665_v12  ;;  %v198_v27 = vcombine.low %v186_v21, %v192_v23 }
  0x21   : > { %v222_v32 = vrot.slane %v214_v26, %v1665_v12  ;;  %v199_v38 = vcombine.high %v186_v21, %v192_v23  ;;  %v298_v41 = vcombine.low %v274_v30, %v290_v31  ;;  %v229_v44 = vrot.slane %v215_v37, %v1665_v12 }
  0x22   : > { %v350_v19 = vcombine.low %v1679_v18, %v1676_v17  ;;  %v206_v33 = vrot.slane %v198_v27, %v1665_v12  ;;  %v299_v46 = vcombine.high %v274_v30, %v290_v31  ;;  %v314_v52 = vcombine.low %v281_v42, %v297_v43 }
  0x23   : > { %v213_v45 = vrot.slane %v199_v38, %v1665_v12  ;;  %v1719_v49 = vrot.slane %v298_v41, %v1705_v39  ;;  %v315_v56 = vcombine.high %v281_v42, %v297_v43 }
  0x24   : > { %733 = vrot.lane.b32.xlu1 %v190_v9, %s1561_s5  ;;  %727 = vrot.lane.b32.xlu0 %v187_v5, %s1561_s5  ;;  %v230_v40 = vcombine.low %v206_v33, %v222_v32  ;;  %v231_v47 = vcombine.high %v206_v33, %v222_v32  ;;  %v313_v50 = vrot.slane %v299_v46, %v1705_v39 }
  0x25   : > { %v246_v51 = vcombine.low %v213_v45, %v229_v44  ;;  %v330_v55 = vcombine.high %v1719_v49, %v1559_v3  ;;  %v322_v58 = vrot.slane %v314_v52, %v1705_v39  ;;  %v247_v60 = vcombine.high %v213_v45, %v229_v44 }
  0x26   : > { %v1716_v48 = vrot.slane %v230_v40, %v1705_v39  ;;  %v245_v53 = vrot.slane %v231_v47, %v1705_v39  ;;  %v331_v59 = vcombine.high %v313_v50, %v1559_v3  ;;  %v329_v1 = vrot.slane %v315_v56, %v1705_v39 }
  0x27   : > { %v254_v57 = vrot.slane %v246_v51, %v1705_v39  ;;  %v332_v2 = vcombine.high %v322_v58, %v1559_v3  ;;  %v261_v5 = vrot.slane %v247_v60, %v1705_v39 }
  0x28   : > { %745 = vrot.lane.b32.xlu1 %v196_v8, %s1561_s5  ;;  %739 = vrot.lane.b32.xlu0 %v193_v4, %s1561_s5  ;;  %v262_v54 = vcombine.high %v1716_v48, %v1559_v3  ;;  %v1361_v61 = vpack.i.bf16 %v245_v53, %v313_v50  ;;  %v263_v63 = vcombine.high %v245_v53, %v1559_v3 }
  0x29   : > { %v1371_v0 = vpack.i.bf16 %v254_v57, %v322_v58  ;;  %v264_v6 = vcombine.high %v254_v57, %v1559_v3  ;;  %v333_v7 = vcombine.high %v329_v1, %v1559_v3  ;;  %v1381_v8 = vpack.i.bf16 %v261_v5, %v329_v1 }
  0x2a   : > { %v1356_v62 = vpack.i.bf16 %v262_v54, %v330_v55  ;;  %v1366_v4 = vpack.i.bf16 %v263_v63, %v331_v59 }
  0x2b   : > { %v1376_v9 = vpack.i.bf16 %v264_v6, %v332_v2 }
  0x2c   : > { %459 = vrot.lane.b32.xlu1 %v189_v20, %s1560_s4  ;;  %453 = vrot.lane.b32.xlu0 %v186_v21, %s1560_s4 }
  0x30   : > { %471 = vrot.lane.b32.xlu1 %v195_v22, %s1560_s4  ;;  %465 = vrot.lane.b32.xlu0 %v192_v23, %s1560_s4 }
  0x34   : > { %731 = vrot.lane.b32.xlu1 %v189_v20, %s1561_s5  ;;  %725 = vrot.lane.b32.xlu0 %v186_v21, %s1561_s5 }
  0x38   : > { %743 = vrot.lane.b32.xlu1 %v195_v22, %s1561_s5  ;;  %737 = vrot.lane.b32.xlu0 %v192_v23, %s1561_s5 }
  0x3c   : > { %463 = vrot.lane.b32.xlu1 %v191_v10, %s1560_s4  ;;  %457 = vrot.lane.b32.xlu0 %v188_v13, %s1560_s4 }
  0x40   : > { %475 = vrot.lane.b32.xlu1 %v1663_v11, %s1560_s4  ;;  %469 = vrot.lane.b32.xlu0 %v1672_v15, %s1560_s4  ;;  %s1191_s4 = sshll.u32 %s177_s30, 4  ;;  %s2024_s4 = int_to_ptr.vmem [resolvable:$true] %s1191_s4 }
  0x44   : > { %735 = vrot.lane.b32.xlu1 %v191_v10, %s1561_s5  ;;  %729 = vrot.lane.b32.xlu0 %v188_v13, %s1561_s5  ;;  %v265_v10 = vcombine.high %v261_v5, %v1559_v3 }
  0x48   : > { %747 = vrot.lane.b32.xlu1 %v1663_v11, %s1561_s5  ;;  %741 = vrot.lane.b32.xlu0 %v1672_v15, %s1561_s5  ;;  %v1386_v11 = vpack.i.bf16 %v265_v10, %v333_v7 }
  0x4c   : > { %1362 = vrot.lane.b32.xlu1 %v1361_v61, %s1563_s6  ;;  %1357 = vrot.lane.b32.xlu0 %v1356_v62, %s1564_s7 }
  0x50   : > { %1372 = vrot.lane.b32.xlu1 %v1371_v0, %s1565_s8  ;;  %1367 = vrot.lane.b32.xlu0 %v1366_v4, %s1566_s9 }
  0x54   : > { %1382 = vrot.lane.b32.xlu1 %v1381_v8, %s1567_s10  ;;  %1377 = vrot.lane.b32.xlu0 %v1376_v9, %s1568_s11 }
  0x58   : > { %1387 = vrot.lane.b32.xlu1 %v1386_v11, %s1569_s18 }
  0x8e   : > { %v468_v13 = vpop.permute.xlu1 %467  ;;  %v456_v14 = vpop.permute.xlu0 %455 }
  0x8f   : > { %v557_v25 = vcombine.low %v456_v14, %v468_v13  ;;  %v558_v54 = vcombine.high %v456_v14, %v468_v13 }
  0x91   : > { %v565_v29 = vrot.slane %v557_v25, %v1665_v12  ;;  %v572_v11 = vrot.slane %v558_v54, %v1665_v12 }
  0x92   : > { %v474_v15 = vpop.permute.xlu1 %473  ;;  %v462_v16 = vpop.permute.xlu0 %461 }
  0x93   : > { %v573_v22 = vcombine.low %v462_v16, %v474_v15  ;;  %v574_v55 = vcombine.high %v462_v16, %v474_v15 }
  0x95   : > { %v581_v26 = vrot.slane %v573_v22, %v1665_v12  ;;  %v588_v6 = vrot.slane %v574_v55, %v1665_v12 }
  0x96   : > { %v734_v20 = vpop.permute.xlu1 %733  ;;  %v728_v21 = vpop.permute.xlu0 %727 }
  0x97   : > { %v589_v30 = vcombine.low %v565_v29, %v581_v26  ;;  %v590_v40 = vcombine.high %v565_v29, %v581_v26  ;;  %v605_v22 = vcombine.low %v572_v11, %v588_v6 }
  0x99   : > { %v1755_v41 = vrot.slane %v589_v30, %v1705_v39  ;;  %v604_v58 = vrot.slane %v590_v40, %v1705_v39 }
  0x9a   : > { %v746_v23 = vpop.permute.xlu1 %745  ;;  %v740_v24 = vpop.permute.xlu0 %739 }
  0x9b   : > { %v845_v33 = vcombine.low %v734_v20, %v746_v23  ;;  %v829_v34 = vcombine.low %v728_v21, %v740_v24  ;;  %v621_v62 = vcombine.high %v1755_v41, %v1559_v3  ;;  %v846_v8 = vcombine.high %v734_v20, %v746_v23 }
  0x9c   : > { %v830_v9 = vcombine.high %v728_v21, %v740_v24 }
  0x9d   : > { %v1758_v44 = vrot.slane %v845_v33, %v1665_v12  ;;  %v1761_v45 = vrot.slane %v829_v34, %v1665_v12  ;;  %v860_v25 = vrot.slane %v846_v8, %v1665_v12 }
  0x9e   : > { %v460_v27 = vpop.permute.xlu1 %459  ;;  %v454_v28 = vpop.permute.xlu0 %453  ;;  %v844_v20 = vrot.slane %v830_v9, %v1665_v12 }
  0x9f   : > { %v862_v59 = vcombine.high %v1761_v45, %v1758_v44 }
  0xa0   : > { %v877_v34 = vcombine.low %v844_v20, %v860_v25 }
  0xa1   : > { %v876_v15 = vrot.slane %v862_v59, %v1705_v39 }
  0xa2   : > { %v472_v31 = vpop.permute.xlu1 %471  ;;  %v466_v32 = vpop.permute.xlu0 %465 }
  0xa3   : > { %v505_v35 = vcombine.low %v460_v27, %v472_v31  ;;  %v489_v36 = vcombine.low %v454_v28, %v466_v32  ;;  %v506_v50 = vcombine.high %v460_v27, %v472_v31  ;;  %v490_v51 = vcombine.high %v454_v28, %v466_v32 }
  0xa4   : > { %v622_v31 = vcombine.high %v604_v58, %v1559_v3  ;;  %v613_v32 = vrot.slane %v605_v22, %v1705_v39 }
  0xa5   : > { %v513_v37 = vrot.slane %v505_v35, %v1665_v12  ;;  %v497_v38 = vrot.slane %v489_v36, %v1665_v12  ;;  %v520_v63 = vrot.slane %v506_v50, %v1665_v12  ;;  %v504_v0 = vrot.slane %v490_v51, %v1665_v12 }
  0xa6   : > { %v732_v42 = vpop.permute.xlu1 %731  ;;  %v726_v43 = vpop.permute.xlu0 %725  ;;  %v606_v50 = vcombine.high %v572_v11, %v588_v6  ;;  %v861_v6 = vcombine.low %v1761_v45, %v1758_v44  ;;  %v1833_v44 = vrot.slane %v350_v19, %v1705_v39 }
  0xa7   : > { %v521_v46 = vcombine.low %v497_v38, %v513_v37  ;;  %v522_v47 = vcombine.high %v497_v38, %v513_v37  ;;  %v537_v13 = vcombine.low %v504_v0, %v520_v63 }
  0xa8   : > { %v1827_v22 = vrot.slane %v861_v6, %v1705_v39  ;;  %v358_v18 = vcombine.high %v1833_v44, %v1559_v3 }
  0xa9   : > { %v1764_v52 = vrot.slane %v521_v46, %v1705_v39  ;;  %v536_v53 = vrot.slane %v522_v47, %v1705_v39  ;;  %v545_v30 = vrot.slane %v537_v13, %v1705_v39  ;;  %v885_v47 = vrot.slane %v877_v34, %v1705_v39 }
  0xaa   : > { %v744_v56 = vpop.permute.xlu1 %743  ;;  %v738_v57 = vpop.permute.xlu0 %737  ;;  %v893_v17 = vcombine.high %v1827_v22, %v1559_v3 }
  0xab   : > { %v777_v60 = vcombine.low %v732_v42, %v744_v56  ;;  %v761_v61 = vcombine.low %v726_v43, %v738_v57  ;;  %v1391_v1 = vpack.i.bf16 %v536_v53, %v604_v58  ;;  %v553_v2 = vcombine.high %v1764_v52, %v1559_v3 }
  0xac   : > { %v554_v23 = vcombine.high %v536_v53, %v1559_v3  ;;  %v778_v27 = vcombine.high %v732_v42, %v744_v56  ;;  %v762_v28 = vcombine.high %v726_v43, %v738_v57  ;;  %v1396_v37 = vpack.i.bf16 %v545_v30, %v613_v32 }
  0xad   : > { %v785_v4 = vrot.slane %v777_v60, %v1665_v12  ;;  %v769_v5 = vrot.slane %v761_v61, %v1665_v12  ;;  %1392 = vrot.lane.b32.xlu0 %v1391_v1, %s1563_s6  ;;  %v1406_v7 = vpack.i.bf16 %v553_v2, %v621_v62  ;;  %v894_v42 = vcombine.high %v876_v15, %v1559_v3 }
  0xae   : > { %v464_v24 = vpop.permute.xlu1 %463  ;;  %v458_v26 = vpop.permute.xlu0 %457  ;;  %v1416_v33 = vpack.i.bf16 %v554_v23, %v622_v31  ;;  %v792_v35 = vrot.slane %v778_v27, %v1665_v12  ;;  %v776_v36 = vrot.slane %v762_v28, %v1665_v12  ;;  %v538_v43 = vcombine.high %v504_v0, %v520_v63 }
  0xaf   : > { %v793_v10 = vcombine.low %v769_v5, %v785_v4  ;;  %v794_v14 = vcombine.high %v769_v5, %v785_v4  ;;  %1407 = vrot.lane.b32.xlu1 %v1406_v7, %s1564_s7  ;;  %v555_v53 = vcombine.high %v545_v30, %v1559_v3  ;;  %v623_v60 = vcombine.high %v613_v32, %v1559_v3 }
  0xb0   : > { %v809_v46 = vcombine.low %v776_v36, %v792_v35  ;;  %v552_v59 = vrot.slane %v538_v43, %v1705_v39  ;;  %v620_v61 = vrot.slane %v606_v50, %v1705_v39  ;;  %v878_v62 = vcombine.high %v844_v20, %v860_v25 }
  0xb1   : > { %v1784_v16 = vrot.slane %v793_v10, %v1705_v39  ;;  %955 = vrot.lane.b32.xlu0 %v876_v15, %s1563_s6  ;;  %v808_v29 = vrot.slane %v794_v14, %v1705_v39  ;;  %v1421_v63 = vpack.i.bf16 %v555_v53, %v623_v60  ;;  %v895_v7 = vcombine.high %v885_v47, %v1559_v3 }
  0xb2   : > { %v476_v38 = vpop.permute.xlu1 %475  ;;  %v470_v40 = vpop.permute.xlu0 %469  ;;  %v817_v56 = vrot.slane %v809_v46, %v1705_v39  ;;  %v1401_v2 = vpack.i.bf16 %v552_v59, %v620_v61  ;;  %v892_v8 = vrot.slane %v878_v62, %v1705_v39  ;;  %v810_v9 = vcombine.high %v776_v36, %v792_v35 }
  0xb3   : > { %v825_v21 = vcombine.high %v1784_v16, %v1559_v3  ;;  %v826_v51 = vcombine.high %v808_v29, %v1559_v3  ;;  %v633_v57 = vcombine.low %v464_v24, %v476_v38  ;;  %v625_v58 = vcombine.low %v458_v26, %v470_v40 }
  0xb4   : > { %v827_v14 = vcombine.high %v817_v56, %v1559_v3  ;;  %v556_v15 = vcombine.high %v552_v59, %v1559_v3  ;;  %v624_v23 = vcombine.high %v620_v61, %v1559_v3 }
  0xb5   : > { %923 = vrot.lane.b32.xlu1 %v825_v21, %s1564_s7  ;;  %927 = vrot.lane.b32.xlu0 %v808_v29, %s1563_s6  ;;  %v640_v0 = vrot.slane %v633_v57, %v1665_v12  ;;  %v632_v1 = vrot.slane %v625_v58, %v1665_v12  ;;  %v824_v21 = vrot.slane %v810_v9, %v1705_v39 }
  0xb6   : > { %v736_v54 = vpop.permute.xlu1 %735  ;;  %v730_v55 = vpop.permute.xlu0 %729  ;;  %v1426_v24 = vpack.i.bf16 %v556_v15, %v624_v23 }
  0xb7   : > { %v641_v10 = vcombine.low %v632_v1, %v640_v0  ;;  %v828_v29 = vcombine.high %v824_v21, %v1559_v3 }
  0xb9   : > { %1417 = vrot.lane.b32.xlu1 %v1416_v33, %s1566_s9  ;;  %1397 = vrot.lane.b32.xlu0 %v1396_v37, %s1565_s8  ;;  %v1836_v45 = vrot.slane %v641_v10, %v1705_v39 }
  0xba   : > { %v748_v4 = vpop.permute.xlu1 %747  ;;  %v742_v5 = vpop.permute.xlu0 %741 }
  0xbb   : > { %v905_v11 = vcombine.low %v736_v54, %v748_v4  ;;  %v897_v13 = vcombine.low %v730_v55, %v742_v5  ;;  %v649_v19 = vcombine.high %v1836_v45, %v1559_v3 }
  0xbd   : > { %959 = vrot.lane.b32.xlu1 %v894_v42, %s1566_s9  ;;  %963 = vrot.lane.b32.xlu0 %v885_v47, %s1565_s8  ;;  %v912_v25 = vrot.slane %v905_v11, %v1665_v12  ;;  %v904_v20 = vrot.slane %v897_v13, %v1665_v12  ;;  %v896_v12 = vcombine.high %v892_v8, %v1559_v3 }
  0xbe   : > { %v1411_v27 = vpack.i.bf16 %v649_v19, %v358_v18  ;;  %v1363_v31 = vpop.permute.xlu1 %1362  ;;  %v1358_v32 = vpop.permute.xlu0 %1357 }
  0xbf   : > { %v913_v26 = vcombine.low %v904_v20, %v912_v25  ;;  %v1360_v46 = vunpack.i.h.bf16 %v1358_v32  ;;  %v1365_v50 = vunpack.i.h.bf16 %v1363_v31  ;;  %v1359_v55 = vunpack.i.l.bf16 %v1358_v32 }
  0xc0   : > { %v1364_v59 = vunpack.i.l.bf16 %v1363_v31 }
  0xc1   : > { %931 = vrot.lane.b32.xlu1 %v826_v51, %s1566_s9  ;;  %935 = vrot.lane.b32.xlu0 %v817_v56, %s1565_s8  ;;  %v1854_v28 = vrot.slane %v913_v26, %v1705_v39  ;;  %v420_v53 = vsel %vm419_vm0, %v1716_v48, %v1360_v46  ;;  %v433_v61 = vsel %vm419_vm0, %v1719_v49, %v1359_v55  ;;  %s1175_s8 = scalar_lea.sflag [#allocation3], %s175_s27  ;;  %s1478_s9 = scalar_lea.vmem %s2024_s4, 256 }
  0xc2   : > { %v1373_v33 = vpop.permute.xlu1 %1372  ;;  %v1368_v34 = vpop.permute.xlu0 %1367  ;;  %v422_v57 = vsel %vm421_vm1, %v420_v53, %v1365_v50  ;;  %p1479_p12 = scmp.ne.s32.totalorder %s2024_s4, %s1478_s9 }
  0xc3   : > { %v921_v30 = vcombine.high %v1854_v28, %v1559_v3  ;;  %v1370_v56 = vunpack.i.h.bf16 %v1368_v34  ;;  %v1375_v62 = vunpack.i.h.bf16 %v1373_v33  ;;  %v1369_v0 = vunpack.i.l.bf16 %v1368_v34 }
  0xc4   : > { %p1480_p13 = pnand %p1479_p12, %p1632_p4 }
  0xc5   : > { %1422 = vrot.lane.b32.xlu1 %v1421_v63, %s1568_s11  ;;  %1402 = vrot.lane.b32.xlu0 %v1401_v2, %s1567_s10  ;;  %v424_v63 = vsel %vm423_vm2, %v422_v57, %v1370_v56  ;;  %v434_v2 = vsel %vm421_vm1, %v433_v61, %v1364_v59 }
  0xc6   : > { %v1863_v35 = vpop.permute.xlu1 %1382  ;;  %v1378_v39 = vpop.permute.xlu0 %1377  ;;  %v426_v6 = vsel %vm425_vm3, %v424_v63, %v1375_v62  ;;  %v435_v9 = vsel %vm423_vm2, %v434_v2, %v1369_v0  ;;  %p1481_p0 = pneg %p1480_p13 }
  0xc7   : > { %v1380_v4 = vunpack.i.h.bf16 %v1378_v39  ;;  %v1385_v10 = vunpack.i.h.bf16 %v1863_v35  ;;  %v1379_v25 = vunpack.i.l.bf16 %v1378_v39 }
  0xc9   : > { %967 = vrot.lane.b32.xlu1 %v895_v7, %s1568_s11  ;;  %971 = vrot.lane.b32.xlu0 %v892_v8, %s1567_s10  ;;  %v1374_v7 = vunpack.i.l.bf16 %v1373_v33 }
  0xca   : > { %v1865_v36 = vpop.permute.xlu1 %1387 }
  0xcb   : > { %v1390_v23 = vunpack.i.h.bf16 %v1865_v36  ;;  %v1389_v55 = vunpack.i.l.bf16 %v1865_v36 }
  0xcd   : > { %939 = vrot.lane.b32.xlu1 %v827_v14, %s1568_s11  ;;  %943 = vrot.lane.b32.xlu0 %v824_v21, %s1567_s10  ;;  %v428_v14 = vsel %vm427_vm4, %v426_v6, %v1380_v4 }
  0xd1   : > { %1427 = vrot.lane.b32.xlu1 %v1426_v24, %s1569_s18  ;;  %951 = vrot.lane.b32.xlu0 %v893_v17, %s1564_s7  ;;  %v430_v17 = vsel %vm429_vm5, %v428_v14, %v1385_v10 }
  0xd2   : > { %v1920_v32 = vsel %vm431_vm6, %v430_v17, %v1390_v23 }
  0xd3   : > { %v1006_v59 = vrot.slane %v1920_v32, 4 }
  0xd5   : > { %975 = vrot.lane.b32.xlu1 %v896_v12, %s1569_s18  ;;  %1412 = vrot.lane.b32.xlu0 %v1411_v27, %s1564_s7  ;;  %v1384_v12 = vunpack.i.l.bf16 %v1863_v35 }
  0xd9   : > { %947 = vrot.lane.b32.xlu1 %v828_v29, %s1569_s18  ;;  %979 = vrot.lane.b32.xlu0 %v921_v30, %s1564_s7  ;;  %s2022_s7 = scalar_lea.hbm %s2072_s3, %s1278_s29 }
 0x11f   : > { %v1867_v37 = vpop.permute.xlu0 %1392 }
 0x120   : > { %v1394_v11 = vunpack.i.l.bf16 %v1867_v37  ;;  %v1395_v35 = vunpack.i.h.bf16 %v1867_v37 }
 0x121   : > { %v1408_v38 = vpop.permute.xlu1 %1407 }
 0x122   : > { %v1409_v48 = vunpack.i.l.bf16 %v1408_v38  ;;  %v1410_v18 = vunpack.i.h.bf16 %v1408_v38 }
 0x123   : > { %v1869_v40 = vpop.permute.xlu0 %955 }
 0x124   : > { %v717_v49 = vsel %vm419_vm0, %v1755_v41, %v1409_v48  ;;  %v436_v41 = vsel %vm425_vm3, %v435_v9, %v1374_v7  ;;  %v710_v34 = vsel %vm419_vm0, %v1764_v52, %v1410_v18 }
 0x125   : > { %v718_v20 = vsel %vm421_vm1, %v717_v49, %v1394_v11  ;;  %v437_v29 = vsel %vm427_vm4, %v436_v41, %v1379_v25  ;;  %v711_v52 = vsel %vm421_vm1, %v710_v34, %v1395_v35 }
 0x126   : > { %v438_v53 = vsel %vm429_vm5, %v437_v29, %v1384_v12 }
 0x127   : > { %v1871_v42 = vpop.permute.xlu1 %923  ;;  %v1873_v3 = vpop.permute.xlu0 %927  ;;  %v439_v7 = vsel %vm431_vm6, %v438_v53, %v1389_v55 }
 0x128   : > { %v982_v48 = vsel %vm419_vm0, %v1784_v16, %v1871_v42 }
 0x129   : > { %v983_v16 = vsel %vm421_vm1, %v982_v48, %v1873_v3 }
 0x12b   : > { %v1875_v43 = vpop.permute.xlu1 %1417  ;;  %v1877_v47 = vpop.permute.xlu0 %1397 }
 0x12c   : > { %v1419_v8 = vunpack.i.l.bf16 %v1875_v43  ;;  %v1399_v21 = vunpack.i.l.bf16 %v1877_v47  ;;  %v1420_v39 = vunpack.i.h.bf16 %v1875_v43  ;;  %v1400_v43 = vunpack.i.h.bf16 %v1877_v47 }
 0x12e   : > { %v719_v24 = vsel %vm423_vm2, %v718_v20, %v1419_v8  ;;  %v712_v62 = vsel %vm423_vm2, %v711_v52, %v1420_v39 }
 0x12f   : > { %v1879_v51 = vpop.permute.xlu1 %959  ;;  %v1883_v54 = vpop.permute.xlu0 %963  ;;  %v720_v30 = vsel %vm425_vm3, %v719_v24, %v1399_v21 }
 0x133   : > { %v1886_v58 = vpop.permute.xlu1 %931  ;;  %v1888_v60 = vpop.permute.xlu0 %935 }
 0x134   : > { %v984_v8 = vsel %vm423_vm2, %v983_v16, %v1886_v58 }
 0x135   : > { %v985_v58 = vsel %vm425_vm3, %v984_v8, %v1888_v60 }
 0x137   : > { %v1893_v1 = vpop.permute.xlu1 %1422  ;;  %v1896_v5 = vpop.permute.xlu0 %1402 }
 0x138   : > { %v1424_v26 = vunpack.i.l.bf16 %v1893_v1  ;;  %v1404_v31 = vunpack.i.l.bf16 %v1896_v5  ;;  %v1425_v36 = vunpack.i.h.bf16 %v1893_v1  ;;  %v713_v1 = vsel %vm425_vm3, %v712_v62, %v1400_v43 }
 0x13a   : > { %v721_v33 = vsel %vm427_vm4, %v720_v30, %v1424_v26  ;;  %v714_v42 = vsel %vm427_vm4, %v713_v1, %v1425_v36 }
 0x13b   : > { %v968_v13 = vpop.permute.xlu1 %967  ;;  %v972_v15 = vpop.permute.xlu0 %971  ;;  %v722_v56 = vsel %vm429_vm5, %v721_v33, %v1404_v31  ;;  %v1570_v31 = vmov 0  }
 0x13c   : > { %1466 = vset.pattern.permute.xlu1 %v1570_v31  ;;  %1467 = vset.pattern.permute.xlu0 %v1570_v31 }
 0x13f   : > { %v940_v19 = vpop.permute.xlu1 %939  ;;  %v1914_v27 = vpop.permute.xlu0 %943 }
 0x143   : > { %v1428_v38 = vpop.permute.xlu1 %1427  ;;  %v952_v50 = vpop.permute.xlu0 %951 }
 0x144   : > { %v1429_v46 = vunpack.i.l.bf16 %v1428_v38  ;;  %v989_v57 = vsel %vm419_vm0, %v1827_v22, %v952_v50 }
 0x145   : > { %v990_v37 = vsel %vm421_vm1, %v989_v57, %v1869_v40 }
 0x146   : > { %v1938_v61 = vsel %vm431_vm6, %v722_v56, %v1429_v46  ;;  %v991_v63 = vsel %vm423_vm2, %v990_v37, %v1879_v51  ;;  %v1405_v51 = vunpack.i.h.bf16 %v1896_v5 }
 0x147   : > { %v1441_v22 = vpack.i.bf16 %v1938_v61, %v1006_v59  ;;  %v992_v47 = vsel %vm425_vm3, %v991_v63, %v1883_v54  ;;  %v1413_v40 = vpop.permute.xlu0 %1412  ;;  %v1430_v54 = vunpack.i.h.bf16 %v1428_v38  ;;  %v976_v9 = vpop.permute.xlu1 %975 }
 0x148   : > { %v993_v0 = vsel %vm427_vm4, %v992_v47, %v968_v13  ;;  %v1415_v2 = vunpack.i.h.bf16 %v1413_v40  ;;  %v1414_v4 = vunpack.i.l.bf16 %v1413_v40 }
 0x149   : > { %1442 = vrot.lane.b32.xlu1 %v1441_v22, %s1569_s18  ;;  %v994_v6 = vsel %vm429_vm5, %v993_v0, %v972_v15  ;;  %v715_v15 = vsel %vm429_vm5, %v714_v42, %v1405_v51 }
 0x14a   : > { %v440_v49 = vsel %vm419_vm0, %v1833_v44, %v1414_v4  ;;  %v995_v13 = vsel %vm431_vm6, %v994_v6, %v976_v9  ;;  %v724_v14 = vsel %vm419_vm0, %v1836_v45, %v1415_v2  ;;  %v1007_v44 = vrot.slane %v439_v7, 4 }
 0x14b   : > { %v980_v10 = vpop.permute.xlu0 %979  ;;  %v1431_v11 = vpack.i.bf16 %v440_v49, %v439_v7  ;;  %v1008_v5 = vrot.slane %v440_v49, 4  ;;  %v716_v20 = vsel %vm431_vm6, %v715_v15, %v1430_v54  ;;  %v1034_v21 = vrot.slane %v995_v13, 4  ;;  %v948_v26 = vpop.permute.xlu1 %947 }
 0x14c   : > { %v996_v3 = vsel %vm419_vm0, %v1854_v28, %v980_v10  ;;  %v1056_v24 = vrot.slane %v724_v14, 4  ;;  %v986_v45 = vsel %vm427_vm4, %v985_v58, %v940_v19  ;;  %v1000_v28 = vrot.slane %v1938_v61, 4 }
 0x14d   : > { %v1035_v25 = vrot.slane %v996_v3, 4  ;;  %1432 = vrot.lane.b32.xlu0 %v1431_v11, %s1567_s10  ;;  %v1436_v23 = vpack.i.bf16 %v1008_v5, %v1007_v44  ;;  %v987_v17 = vsel %vm429_vm5, %v986_v45, %v1914_v27  ;;  %v1451_v60 = vpack.i.bf16 %v1034_v21, %v724_v14  ;;  %v1085_v27 = vld [vmem:[%s2071_s2] sm:$0xff] }
 0x14e   : > { %v1456_v18 = vpack.i.bf16 %v1056_v24, %v1000_v28  ;;  %v999_v12 = vrot.slane %v716_v20, 4  ;;  %v988_v29 = vsel %vm431_vm6, %v987_v17, %v948_v26  ;;  %v1077_v57 = vsel %vm1075_vm7, %v439_v7, %v1000_v28 }
 0x14f   : > { %v1446_v41 = vpack.i.bf16 %v716_v20, %v1035_v25  ;;  %v1033_v30 = vrot.slane %v988_v29, 4 }
 0x150   : > { %v1461_v19 = vpack.i.bf16 %v999_v12, %v1920_v32  ;;  %v1076_v52 = vsel %vm1075_vm7, %v1920_v32, %v999_v12 }
 0x151   : > { %1447 = vrot.lane.b32.xlu1 %v1446_v41, %s1569_s18  ;;  %1437 = vrot.lane.b32.xlu0 %v1436_v23, %s1569_s18  ;;  %v1084_v41 = vld [vmem:[%s2070_s1] sm:$0xff] }
 0x155   : > { %1457 = vrot.lane.b32.xlu1 %v1456_v18, %s1567_s10  ;;  %1452 = vrot.lane.b32.xlu0 %v1451_v60, %s1569_s18 }
 0x159   : > { %1462 = vrot.lane.b32.xlu1 %v1461_v19, %s1567_s10  ;;  %1036 = vrot.lane.b32.xlu0 %v1033_v30, %s1569_s18 }
 0x15d   : > { %1071 = vrot.lane.b32.xlu1 %v996_v3, %s1567_s10  ;;  %1069 = vrot.lane.b32.xlu0 %v995_v13, %s1567_s10 }
 0x161   : > { %1067 = vrot.lane.b32.xlu0 %v988_v29, %s1567_s10  ;;  %1088 = vperm.xlu1 %1466, %v1085_v27   ;;  %s1482_s10 = sshll.u32 %s1571_s15, 4  ;;  %s1483_s10 = int_to_ptr.vmem [resolvable:$false] %s1482_s10 }
 0x162   : > { %s1484_s11 = scalar_lea.vmem %s1483_s10, 512  ;;  %p1485_p1 = scmp.lt.s32.totalorder %s2024_s4, %s1483_s10 }
 0x163   : > { %p1486_p2 = scmp.lt.s32.totalorder %s1484_s11, %s1478_s9 }
 0x165   : > { %p1487_p3 = por %p1486_p2, %p1485_p1 }
 0x167   : > { %p1488_p5 = pnand %p1487_p3, %p1481_p0 }
 0x1bb   : > { %v1443_v33 = vpop.permute.xlu1 %1442 }
 0x1bc   : > { %v1444_v35 = vunpack.i.l.bf16 %v1443_v33  ;;  %v1445_v43 = vunpack.i.h.bf16 %v1443_v33 }
 0x1bf   : > { %v1433_v34 = vpop.permute.xlu0 %1432 }
 0x1c0   : > { %v1435_v53 = vunpack.i.h.bf16 %v1433_v34  ;;  %v1434_v55 = vunpack.i.l.bf16 %v1433_v34 }
 0x1c2   : > { %v1053_v0 = vsel %vm429_vm5, %v1434_v55, %v1435_v53 }
 0x1c3   : > { %v1448_v39 = vpop.permute.xlu1 %1447  ;;  %v1438_v38 = vpop.permute.xlu0 %1437 }
 0x1c4   : > { %v1440_v46 = vunpack.i.h.bf16 %v1438_v38  ;;  %v1439_v50 = vunpack.i.l.bf16 %v1438_v38  ;;  %v1449_v37 = vunpack.i.l.bf16 %v1448_v39  ;;  %v1450_v1 = vunpack.i.h.bf16 %v1448_v39 }
 0x1c6   : > { %v1016_v56 = vsel %vm431_vm6, %v1439_v50, %v1440_v46  ;;  %v1015_v59 = vsel %vm431_vm6, %v1444_v35, %v1439_v50 }
 0x1c7   : > { %v1458_v61 = vpop.permute.xlu1 %1457  ;;  %v1453_v62 = vpop.permute.xlu0 %1452  ;;  %v1079_v36 = vsel %vm1075_vm7, %v995_v13, %v1016_v56  ;;  %v1078_v63 = vsel %vm1075_vm7, %v988_v29, %v1015_v59  ;;  %v1026_v13 = vsel %vm431_vm6, %v1450_v1, %v1445_v43 }
 0x1c8   : > { %v1460_v22 = vunpack.i.h.bf16 %v1458_v61  ;;  %v1459_v48 = vunpack.i.l.bf16 %v1458_v61  ;;  %v1455_v47 = vunpack.i.h.bf16 %v1453_v62  ;;  %v1454_v40 = vunpack.i.l.bf16 %v1453_v62 }
 0x1c9   : > { %v1279_v2 = vpack.c.bf16 %v1079_v36, %v1077_v57  ;;  %v1281_v4 = vpack.c.bf16 %v1078_v63, %v1076_v52 }
 0x1ca   : > { %v1064_v51 = vsel %vm429_vm5, %v1459_v48, %v1460_v22  ;;  %v1043_v32 = vsel %vm431_vm6, %v1455_v47, %v1449_v37  ;;  %v1027_v6 = vsel %vm431_vm6, %v1445_v43, %v1454_v40 }
 0x1cb   : > { %1280 = vmatprep.subr.bf16.mxu0 %v1279_v2  ;;  %v1463_v7 = vpop.permute.xlu1 %1462  ;;  %v1037_v16 = vpop.permute.xlu0 %1036  ;;  %v1081_v42 = vsel %vm1075_vm7, %v1027_v6, %v1043_v32  ;;  %v1083_v54 = vsel %vm1075_vm7, %v1053_v0, %v1064_v51 }
 0x1cc   : > { %v1465_v49 = vunpack.i.h.bf16 %v1463_v7  ;;  %v1464_v8 = vunpack.i.l.bf16 %v1463_v7  ;;  %v1042_v9 = vsel %vm431_vm6, %v1037_v16, %v1455_v47  ;;  %1282 = vmatpush1.bf16.msra.mxu0 %v1281_v4  ;;  %v1283_v10 = vpack.c.bf16 %v1083_v54, %v1081_v42 }
 0x1cd   : > { %v1080_v14 = vsel %vm1075_vm7, %v1026_v13, %v1042_v9 }
 0x1ce   : > { %v1052_v11 = vsel %vm429_vm5, %v1464_v8, %v1434_v55  ;;  %v1063_v5 = vsel %vm429_vm5, %v1465_v49, %v1459_v48  ;;  %1284 = vmatprep.subr.bf16.mxu0 %v1283_v10 }
 0x1cf   : > { %v1072_v3 = vpop.permute.xlu1 %1071  ;;  %v1070_v15 = vpop.permute.xlu0 %1069  ;;  %v1082_v25 = vsel %vm1075_vm7, %v1052_v11, %v1063_v5 }
 0x1d0   : > { %v1285_v44 = vpack.c.bf16 %v1082_v25, %v1080_v14  ;;  %v1074_v58 = vsel %vm429_vm5, %v1070_v15, %v1072_v3 }
 0x1d2   : > { %1286 = vmatpush1.bf16.msra.mxu0 %v1285_v44 }
 0x1d3   : > { %v1068_v20 = vpop.permute.xlu0 %1067  ;;  %1270 = vmatprep.subr.msk.mxu0 %vm1075_vm7, %v1074_v58 }
 0x1d4   : > { %v1073_v21 = vsel %vm429_vm5, %v1068_v20, %v1070_v15 }
 0x1d6   : > { %1271 = vmatpush1.msk.msra.mxu0 %vm1075_vm7, %v1073_v21 }
 0x1d7   : > { %1272 = vmatmul.mubr.msk.f32.vlgmr.msra.gmra.mrb[0].mxu0 %vm1091_vm8, %v1084_v41 }
 0x1e0   : > { %v1089_v23 = vpop.permute.xlu1 %1088 }
 0x2aa   : > { %v1165_v24 = vpop.f32.mrb[0].mxu0 }
 0x2ab   : > { %v1166_v45 = vadd.f32 %v1165_v24, %v1089_v23  ;;  %v1167_v26 = vpop.f32.mrb[1].mxu0 }
 0x2ac   : > { %v1168_v28 = vadd.f32 %v1167_v26, %v1089_v23 }
 0x2ad   : > { %v1170_v17 = vmax.f32 %v1166_v45, 0.0 }
 0x2ae   : > { %v1171_v18 = vmax.f32 %v1168_v28, 0.0 }
 0x2af   : > { %1172 = vst [vmem:[%s177_s30] sm:$0xff] %v1170_v17 }
 0x2b0   : > { %1173 = vst [vmem:[%s177_s30 + $0x8] sm:$0xff] %v1171_v18 }
 0x2b1   : > { %1491 = shalt.err (!%p1488_p5)
}
 0x2b2   : > { %s1492_s18 = scalar_lea.hbm %s2022_s7, 256  ;;  %s1496_s23 = scalar_lea.hbm %s2072_s3, 512 }
 0x2b3   : > { %p1493_p6 = scmp.ne.s32.totalorder %s2022_s7, %s1492_s18  ;;  %p1497_p10 = scmp.lt.u32.totalorder %s2022_s7, %s2072_s3 }
 0x2b4   : > { %p1498_p11 = scmp.lt.u32.totalorder %s1496_s23, %s1492_s18  ;;  %p1500_p13 = scmp.lt.u32.totalorder %s1492_s18, %s2022_s7 }
 0x2b5   : > { %p1494_p7 = pnand %p1493_p6, %p1632_p4 }
 0x2b6   : > { %p1499_p12 = por %p1498_p11, %p1497_p10 }
 0x2b7   : > { %p1495_p9 = pneg %p1494_p7 }
 0x2b8   : > { %p1501_p0 = por %p1500_p13, %p1499_p12 }
 0x2ba   : > { %p1502_p1 = pnand %p1501_p0, %p1495_p9 }
 0x2bc   : > { %1505 = shalt.err (!%p1502_p1)
}
 0x2bd   : > { %1288 = dma.vmem_to_hbm [thread:$0]  (%p1632_p4), %s2024_s4, 256, %s2022_s7, %s1175_s8  }
 0x2be PF: > { %p1294_p2 = scmp.ge.s32.totalorder %s1556_s17, 2  ;;  %s1203_s28 = sand.u32 1, %s1536_s12  }
 0x2bf   : > { %s1204_s29 = scalar_lea.sflag [#allocation3], %s1203_s28 }
 0x2c0   : > { %p1291_p3 = pnand %p1294_p2, %p1639_p8 }
 0x2c2   : > { %1531 = dma.done.wait (!%p1291_p3), %s1204_s29, 256  }
 0x2c3   : > { %1533 = vsyncadd (!%p1291_p3), %s1204_s29, 4294967040  ;;  %s16_s17 = sadd.s32 1, %s1556_s17   ;;  %s2075_s12 = smov %s1540_s13 }
 0x2c4   : > { %p13_p5 = scmp.ge.s32.totalorder %s16_s17, 4   ;;  %s2076_s13 = smov %s1544_s14 }
 0x2c5   : > { %s2077_s14 = smov %s1645_s25  ;;  %s2078_s15 = smov %s1552_s16 }
 0x2c6   : > { %s2079_s16 = smov %s2081_s20  ;;  %15 = sbr.rel (!%p13_p5) target bundleno = 4 (0x4), region = 68 }
 0x2cd   :  { %1209 = vsyncpa [#allocation3], 1 }
 0x2ce   :  { %1211 = vsyncpa [#allocation3 + $0x1], 1 }

</bundles_post_ra>
